<compile_context>
chip_gen: v7x
topology: tpu7x:2x2x1
jax: 0.10.0
libtpu: 0.0.40
codegen_flags: <defaults>
</compile_context>

<pallas_src>
import functools
import math

import jax
import jax.numpy as jnp
from jax.experimental import pallas as pl
from jax.experimental.pallas import tpu as pltpu


def _num_tensorcores():
    """Best-effort TensorCores-per-device (v7x: 2, v5e/v6e: 1)."""
    try:
        info = pltpu.get_tpu_info()
        for name in ("num_cores", "core_count", "num_tensorcores",
                     "tensorcore_count", "num_cores_per_chip"):
            v = getattr(info, name, None)
            if isinstance(v, int) and v > 0:
                return min(int(v), 2)
    except Exception:
        pass
    try:
        kind = jax.devices()[0].device_kind.lower()
        if "7x" in kind or "v7" in kind:
            return 2
    except Exception:
        pass
    return 1


def _dice_partial_kernel(x_ref, t_ref, o_ref, acc_i_ref, acc_u_ref, *,
                         n_total, steps, block_g, sub, lanes,
                         need_mask, need_guard):
    """Accumulates per-core partial [intersection, union] sums into o_ref."""
    c = pl.program_id(0)            # "parallel" axis (per-TensorCore split)
    j = pl.program_id(1)            # "arbitrary" reduction axis
    nj = pl.num_programs(1)
    step = c * nj + j               # global block index (unclamped)

    chunk = 8 * lanes
    full_groups = n_total // chunk  # number of completely-valid groups
    rem = n_total % chunk           # valid elements in the partial group
    nsub = block_g // sub

    @pl.when(j == 0)
    def _init():
        acc_i_ref[...] = jnp.zeros_like(acc_i_ref)
        acc_u_ref[...] = jnp.zeros_like(acc_u_ref)

    def _accumulate(masked):
        def body(i):
            g0 = pl.multiple_of(i * sub, sub)
            x = x_ref[pl.ds(g0, sub)].astype(jnp.float32)
            t = t_ref[pl.ds(g0, sub)].astype(jnp.float32)
            # sigmoid: EUP exp + EUP approx reciprocal + one Newton step.
            # Clamp the denominator so exp overflow (x << 0) yields pre ~ 0
            # rather than inf*0 = NaN in the Newton refinement.
            d = jnp.minimum(1.0 + jnp.exp(-x), jnp.float32(1e30))
            r = pl.reciprocal(d, approx=True)
            pre = r * (2.0 - d * r)
            if masked:
                # Tail mask (last real step only): compare group and
                # within-group indices (no flat-index int32 overflow).
                g = jax.lax.broadcasted_iota(jnp.int32, x.shape, 0)
                s = jax.lax.broadcasted_iota(jnp.int32, x.shape, 1)
                l = jax.lax.broadcasted_iota(jnp.int32, x.shape, 2)
                gi = step * block_g + g0 + g
                wi = s * lanes + l
                valid = jnp.logical_or(
                    gi < full_groups,
                    jnp.logical_and(gi == full_groups, wi < rem))
                pre = jnp.where(valid, pre, 0.0)
                t = jnp.where(valid, t, 0.0)
            # Pure VPU: fold the (sub, 8, lanes) contribution onto the
            # (8, lanes) accumulators; the single cross-lane/sublane reduce
            # happens once, in the finalize step.
            acc_i_ref[...] += jnp.sum(pre * t, axis=0)
            acc_u_ref[...] += jnp.sum(pre + t, axis=0)

        pl.loop(0, nsub)(body)

    if need_mask:
        @pl.when(step < steps - 1)
        def _fast():
            _accumulate(False)

        @pl.when(step == steps - 1)
        def _last():
            _accumulate(True)
    elif need_guard:
        @pl.when(step < steps)
        def _all():
            _accumulate(False)
    else:
        _accumulate(False)

    @pl.when(j == nj - 1)
    def _finalize():
        # One cross-lane/sublane reduce per core, once per kernel call.
        o_ref[0, 0] = jnp.sum(acc_i_ref[...])
        o_ref[0, 1] = jnp.sum(acc_u_ref[...])


def dice_loss(predict, target, *, epsilon=1.0, lanes=None, block_bytes=4 << 20,
              block_g=None, num_cores=None):
    """Pallas implementation of DiceLoss.forward. Returns a scalar f32 score."""
    assert predict.shape == target.shape, (
        "the size of predict and target must be equal.")
    n_total = math.prod(predict.shape)
    if n_total == 0:
        return jnp.float32(0.0)   # 1 - eps/eps

    # Flatten (layout-preserving reshape); keep native dtype (bf16 halves HBM
    # traffic; the f32 cast happens inside the kernel).
    x = predict.reshape(-1)
    t = target.reshape(-1)

    # Lane-dense layout (groups, 8, lanes): widest lanes that need no padding.
    if lanes is None:
        lanes = 128
        for cand in (1024, 512, 256, 128):
            if n_total % (8 * cand) == 0:
                lanes = cand
                break
    chunk = 8 * lanes
    pad = (-n_total) % chunk
    if pad:
        # Rare ragged fallback; padded elements are masked in-kernel.
        x = jnp.pad(x, (0, pad))
        t = jnp.pad(t, (0, pad))
    g_total = (n_total + pad) // chunk
    x3 = x.reshape(g_total, 8, lanes)
    t3 = t.reshape(g_total, 8, lanes)

    # Block sizing: ~block_bytes (default 4 MiB) per input, measured in the
    # ACTUAL dtype's bytes.  The in-kernel compute runs over `sub`-group
    # sub-chunks (~512 KiB of f32) so f32 temporaries stay bounded.
    itemsize = max(x3.dtype.itemsize, t3.dtype.itemsize)
    sub = max(1, min((512 * 1024) // (chunk * 4), g_total))
    if block_g is None:
        block_g = sub * max(1, int(block_bytes) // (chunk * itemsize * sub))
        block_g = min(block_g, pl.cdiv(g_total, sub) * sub)
    else:                      # explicit override (used by the tests)
        block_g = max(1, int(block_g))
        sub = min(sub, block_g)
        block_g = pl.cdiv(block_g, sub) * sub
    steps = pl.cdiv(g_total, block_g)

    # One TensorCore per chip on v5e/v6e; 2-way "parallel" split on v7x.
    # TODO(synk): on v7x hardware, verify the leading "parallel" axis really
    # shards across the two TensorCores (else switch to pltpu.CORE_PARALLEL).
    if num_cores is None:
        num_cores = _num_tensorcores()
    p = max(1, min(int(num_cores), steps))
    steps_per_core = pl.cdiv(steps, p)

    need_guard = (p * steps_per_core != steps)        # surplus (skipped) steps
    need_mask = (steps * block_g * chunk != n_total)  # last block has a tail

    def in_map(c, j):
        step = c * steps_per_core + j
        if need_guard:
            step = jnp.minimum(step, steps - 1)
        return (step, 0, 0)

    kernel = functools.partial(
        _dice_partial_kernel, n_total=n_total, steps=steps, block_g=block_g,
        sub=sub, lanes=lanes, need_mask=need_mask, need_guard=need_guard)

    partials = pl.pallas_call(
        kernel,
        out_shape=jax.ShapeDtypeStruct((p, 2), jnp.float32),
        grid_spec=pltpu.PrefetchScalarGridSpec(
            num_scalar_prefetch=0,
            grid=(p, steps_per_core),
            in_specs=[
                pl.BlockSpec((block_g, 8, lanes), in_map),
                pl.BlockSpec((block_g, 8, lanes), in_map),
            ],
            out_specs=pl.BlockSpec((1, 2), lambda c, j: (c, 0),
                                   memory_space=pltpu.SMEM),
            scratch_shapes=[
                pltpu.VMEM((8, lanes), jnp.float32),
                pltpu.VMEM((8, lanes), jnp.float32),
            ],
        ),
        compiler_params=pltpu.CompilerParams(
            dimension_semantics=("parallel", "arbitrary"),
            vmem_limit_bytes=48 * 1024 * 1024,
        ),
    )(x3, t3)

    intersection = jnp.sum(partials[:, 0])
    union = jnp.sum(partials[:, 1])
    eps = jnp.float32(epsilon)
    return 1.0 - (2.0 * intersection + eps) / (union + eps)


def _dice_loss_ref(predict, target, epsilon=1.0):
    pre = jax.nn.sigmoid(predict.astype(jnp.float32)).reshape(-1)
    tar = target.astype(jnp.float32).reshape(-1)
    intersection = jnp.sum(pre * tar)
    union = jnp.sum(pre + tar)
    return 1.0 - (2.0 * intersection + epsilon) / (union + epsilon)


if __name__ == "__main__":
    key = jax.random.PRNGKey(0)
    ks = jax.random.split(key, 8)

    # Tolerances account for the EUP approx-reciprocal (+1 Newton step) and
    # summation-order differences vs. the pure-JAX reference.
    F32_TOL = dict(rtol=1e-3, atol=5e-4)
    BF16_TOL = dict(rtol=1e-3, atol=1e-3)

    # 1) Main case: NCHW logits + binary targets, default (auto) config.
    shape = (2, 4, 16, 16)
    predict = jax.random.normal(ks[0], shape, jnp.float32)
    target = (jax.random.uniform(ks[1], shape) > 0.5).astype(jnp.float32)
    out = jax.block_until_ready(dice_loss(predict, target))
    ref = _dice_loss_ref(predict, target)
    assert jnp.allclose(out, ref, **F32_TOL), (out, ref)

    # 2) Native-dtype (bf16) DMA path: cast to f32 only inside the kernel.
    out_bf = jax.block_until_ready(
        dice_loss(predict.astype(jnp.bfloat16), target.astype(jnp.bfloat16)))
    ref_bf = _dice_loss_ref(predict.astype(jnp.bfloat16),
                            target.astype(jnp.bfloat16))
    assert jnp.allclose(out_bf, ref_bf, **BF16_TOL), (out_bf, ref_bf)

    # 3) Multi-step accumulation + 2-way split (steps divisible, no mask/guard).
    shape2 = (2, 4, 64, 64)
    p2 = jax.random.normal(ks[2], shape2, jnp.float32)
    t2 = (jax.random.uniform(ks[3], shape2) > 0.5).astype(jnp.float32)
    out2 = jax.block_until_ready(dice_loss(p2, t2, block_g=1, num_cores=2))
    ref2 = _dice_loss_ref(p2, t2)
    assert jnp.allclose(out2, ref2, **F32_TOL), (out2, ref2)

    # 4) Surplus-step guard path (steps=3 split over 2 "cores").
    shape4 = (2, 4, 48, 64)
    p4 = jax.random.normal(ks[4], shape4, jnp.float32)
    t4 = (jax.random.uniform(ks[5], shape4) > 0.5).astype(jnp.float32)
    out4 = jax.block_until_ready(dice_loss(p4, t4, block_g=1, num_cores=2))
    ref4 = _dice_loss_ref(p4, t4)
    assert jnp.allclose(out4, ref4, **F32_TOL), (out4, ref4)

    # 5) Ragged shape: pad + last-step-only tail mask.
    shape3 = (3, 5, 7, 11)
    p3 = jax.random.normal(ks[6], shape3, jnp.float32)
    t3 = (jax.random.uniform(ks[7], shape3) > 0.5).astype(jnp.float32)
    out3 = jax.block_until_ready(dice_loss(p3, t3, block_g=1, num_cores=2))
    ref3 = _dice_loss_ref(p3, t3)
    assert jnp.allclose(out3, ref3, **F32_TOL), (out3, ref3)

    print("KERNEL_OK")
</pallas_src>

<mosaic_0001>
module attributes {stable_mosaic.version = 11 : i64} {
  func.func @_dice_partial_kernel(%arg0: i32, %arg1: i32, %arg2: memref<1x8x256xf32, #tpu.memory_space<vmem>>, %arg3: memref<1x8x256xf32, #tpu.memory_space<vmem>>, %arg4: memref<1x2xf32, #tpu.memory_space<smem>>, %arg5: memref<8x256xf32, #tpu.memory_space<vmem>>, %arg6: memref<8x256xf32, #tpu.memory_space<vmem>>) attributes {dimension_semantics = [#tpu.dimension_semantics<parallel>, #tpu.dimension_semantics<arbitrary>], iteration_bounds = array<i64: 1, 1>, scalar_prefetch = 0 : i64, scratch_operands = 2 : i64, tpu.core_type = #tpu.core_type<tc>, window_params = [{transform_indices = @transform_0, window_bounds = array<i64: 1, 8, 256>}, {transform_indices = @transform_1, window_bounds = array<i64: 1, 8, 256>}, {transform_indices = @transform_2, window_bounds = array<i64: 1, 2>}]} {
    %c0_i32 = arith.constant 0 : i32
    %0 = arith.cmpi eq, %arg1, %c0_i32 : i32
    %1 = arith.extui %0 : i1 to i32
    %c0_i32_0 = arith.constant 0 : i32
    %2 = arith.cmpi ne, %1, %c0_i32_0 : i32
    scf.if %2 {
      %cst_23 = arith.constant 0.000000e+00 : f32
      %36 = vector.broadcast %cst_23 : f32 to vector<8x256xf32>
      %c0_24 = arith.constant 0 : index
      %c0_25 = arith.constant 0 : index
      %37 = vector.load %arg5[%c0_24, %c0_25] : memref<8x256xf32, #tpu.memory_space<vmem>>, vector<8x256xf32>
      tpu.vector_store %arg5[%c0_24, %c0_25], %36 {strides = array<i32>} : memref<8x256xf32, #tpu.memory_space<vmem>>, vector<8x256xf32>,
      %cst_26 = arith.constant 0.000000e+00 : f32
      %38 = vector.broadcast %cst_26 : f32 to vector<8x256xf32>
      %c0_27 = arith.constant 0 : index
      %c0_28 = arith.constant 0 : index
      %39 = vector.load %arg6[%c0_27, %c0_28] : memref<8x256xf32, #tpu.memory_space<vmem>>, vector<8x256xf32>
      tpu.vector_store %arg6[%c0_27, %c0_28], %38 {strides = array<i32>} : memref<8x256xf32, #tpu.memory_space<vmem>>, vector<8x256xf32>,
    } else {
    }
    %c0_i32_1 = arith.constant 0 : i32
    %c1_i32 = arith.constant 1 : i32
    %3 = arith.muli %c0_i32_1, %c1_i32 : i32
    %c0_i32_2 = arith.constant 0 : i32
    %4 = arith.addi %c0_i32_2, %3 : i32
    %c1_i32_3 = arith.constant 1 : i32
    %5 = arith.muli %4, %c1_i32_3 : i32
    %6 = tpu.assume_multiple %5, 1 : i32
    %7 = arith.index_cast %6 : i32 to index
    %c0 = arith.constant 0 : index
    %c0_4 = arith.constant 0 : index
    %8 = vector.load %arg2[%7, %c0, %c0_4] : memref<1x8x256xf32, #tpu.memory_space<vmem>>, vector<1x8x256xf32>
    %9 = arith.index_cast %6 : i32 to index
    %c0_5 = arith.constant 0 : index
    %c0_6 = arith.constant 0 : index
    %10 = vector.load %arg3[%9, %c0_5, %c0_6] : memref<1x8x256xf32, #tpu.memory_space<vmem>>, vector<1x8x256xf32>
    %cst = arith.constant 0.000000e+00 : f32
    %11 = vector.broadcast %cst : f32 to vector<1x8x256xf32>
    %12 = arith.subf %11, %8 : vector<1x8x256xf32>
    %13 = math.exp %12 : vector<1x8x256xf32>
    %cst_7 = arith.constant 1.000000e+00 : f32
    %14 = vector.broadcast %cst_7 : f32 to vector<1x8x256xf32>
    %15 = arith.addf %14, %13 : vector<1x8x256xf32>
    %cst_8 = arith.constant 1.000000e+30 : f32
    %16 = vector.broadcast %cst_8 : f32 to vector<1x8x256xf32>
    %17 = arith.minimumf %15, %16 : vector<1x8x256xf32>
    %18 = tpu.reciprocal %17 {approx = true} : vector<1x8x256xf32> -> vector<1x8x256xf32>
    %19 = arith.mulf %17, %18 : vector<1x8x256xf32>
    %cst_9 = arith.constant 2.000000e+00 : f32
    %20 = vector.broadcast %cst_9 : f32 to vector<1x8x256xf32>
    %21 = arith.subf %20, %19 : vector<1x8x256xf32>
    %22 = arith.mulf %18, %21 : vector<1x8x256xf32>
    %c0_10 = arith.constant 0 : index
    %c0_11 = arith.constant 0 : index
    %23 = vector.load %arg5[%c0_10, %c0_11] : memref<8x256xf32, #tpu.memory_space<vmem>>, vector<8x256xf32>
    %24 = arith.mulf %22, %10 : vector<1x8x256xf32>
    %cst_12 = arith.constant dense<0.000000e+00> : vector<8x256xf32>
    %25 = vector.multi_reduction <add>, %24, %cst_12 [0] : vector<1x8x256xf32> to vector<8x256xf32>
    %26 = arith.addf %23, %25 : vector<8x256xf32>
    %c0_13 = arith.constant 0 : index
    %c0_14 = arith.constant 0 : index
    %27 = vector.load %arg5[%c0_13, %c0_14] : memref<8x256xf32, #tpu.memory_space<vmem>>, vector<8x256xf32>
    tpu.vector_store %arg5[%c0_13, %c0_14], %26 {strides = array<i32>} : memref<8x256xf32, #tpu.memory_space<vmem>>, vector<8x256xf32>,
    %c0_15 = arith.constant 0 : index
    %c0_16 = arith.constant 0 : index
    %28 = vector.load %arg6[%c0_15, %c0_16] : memref<8x256xf32, #tpu.memory_space<vmem>>, vector<8x256xf32>
    %29 = arith.addf %22, %10 : vector<1x8x256xf32>
    %cst_17 = arith.constant dense<0.000000e+00> : vector<8x256xf32>
    %30 = vector.multi_reduction <add>, %29, %cst_17 [0] : vector<1x8x256xf32> to vector<8x256xf32>
    %31 = arith.addf %28, %30 : vector<8x256xf32>
    %c0_18 = arith.constant 0 : index
    %c0_19 = arith.constant 0 : index
    %32 = vector.load %arg6[%c0_18, %c0_19] : memref<8x256xf32, #tpu.memory_space<vmem>>, vector<8x256xf32>
    tpu.vector_store %arg6[%c0_18, %c0_19], %31 {strides = array<i32>} : memref<8x256xf32, #tpu.memory_space<vmem>>, vector<8x256xf32>,
    %c1_i32_20 = arith.constant 1 : i32
    %c0_i32_21 = arith.constant 0 : i32
    %33 = arith.cmpi eq, %arg1, %c0_i32_21 : i32
    %34 = arith.extui %33 : i1 to i32
    %c0_i32_22 = arith.constant 0 : i32
    %35 = arith.cmpi ne, %34, %c0_i32_22 : i32
    scf.if %35 {
      %c0_23 = arith.constant 0 : index
      %c0_24 = arith.constant 0 : index
      %36 = vector.load %arg5[%c0_23, %c0_24] : memref<8x256xf32, #tpu.memory_space<vmem>>, vector<8x256xf32>
      %37 = vector.shape_cast %36 : vector<8x256xf32> to vector<1x8x256xf32>
      %cst_25 = arith.constant dense<0.000000e+00> : vector<1xf32>
      %38 = vector.multi_reduction <add>, %37, %cst_25 [1, 2] : vector<1x8x256xf32> to vector<1xf32>
      %39 = vector.shape_cast %38 : vector<1xf32> to vector<1x1x1xf32>
      %40 = vector.extract %39[0, 0, 0] : f32 from vector<1x1x1xf32>
      %c0_26 = arith.constant 0 : index
      %c0_27 = arith.constant 0 : index
      %41 = memref.load %arg4[%c0_26, %c0_27] : memref<1x2xf32, #tpu.memory_space<smem>>
      memref.store %40, %arg4[%c0_26, %c0_27] : memref<1x2xf32, #tpu.memory_space<smem>>
      %c0_28 = arith.constant 0 : index
      %c0_29 = arith.constant 0 : index
      %42 = vector.load %arg6[%c0_28, %c0_29] : memref<8x256xf32, #tpu.memory_space<vmem>>, vector<8x256xf32>
      %43 = vector.shape_cast %42 : vector<8x256xf32> to vector<1x8x256xf32>
      %cst_30 = arith.constant dense<0.000000e+00> : vector<1xf32>
      %44 = vector.multi_reduction <add>, %43, %cst_30 [1, 2] : vector<1x8x256xf32> to vector<1xf32>
      %45 = vector.shape_cast %44 : vector<1xf32> to vector<1x1x1xf32>
      %46 = vector.extract %45[0, 0, 0] : f32 from vector<1x1x1xf32>
      %c0_31 = arith.constant 0 : index
      %c1 = arith.constant 1 : index
      %47 = memref.load %arg4[%c0_31, %c1] : memref<1x2xf32, #tpu.memory_space<smem>>
      memref.store %46, %arg4[%c0_31, %c1] : memref<1x2xf32, #tpu.memory_space<smem>>
    } else {
    }
    return
  }
  func.func @transform_0(%arg0: i32, %arg1: i32) -> (i32, i32, i32) {
    %c1_i32 = arith.constant 1 : i32
    %0 = arith.muli %arg0, %c1_i32 : i32
    %1 = arith.addi %0, %arg1 : i32
    %c0_i32 = arith.constant 0 : i32
    %c0_i32_0 = arith.constant 0 : i32
    %c0_i32_1 = arith.constant 0 : i32
    return %1, %c0_i32, %c0_i32_0 : i32, i32, i32
  }
  func.func @transform_1(%arg0: i32, %arg1: i32) -> (i32, i32, i32) {
    %c1_i32 = arith.constant 1 : i32
    %0 = arith.muli %arg0, %c1_i32 : i32
    %1 = arith.addi %0, %arg1 : i32
    %c0_i32 = arith.constant 0 : i32
    %c0_i32_0 = arith.constant 0 : i32
    %c0_i32_1 = arith.constant 0 : i32
    return %1, %c0_i32, %c0_i32_0 : i32, i32, i32
  }
  func.func @transform_2(%arg0: i32, %arg1: i32) -> (i32, i32) {
    %c0_i32 = arith.constant 0 : i32
    %c0_i32_0 = arith.constant 0 : i32
    return %arg0, %c0_i32 : i32, i32
  }
}

</mosaic_0001>

<bundles_post_ra>
// kernel: tpu_custom_call.1
= control target key start
LH: loop header
LB: loop body
LE: loop exit
PB: predicated region body
PF: predicated region fallthrough
CT: control target
= control target key end

     0   :  { %7 = vsyncpa [#allocation5], 0  ;;  %s276_s0 = inlined_call_operand.hbm [shape: f32[1,8,256], index: 0, kind: input, shape index: {}]   ;;  %s277_s1 = inlined_call_operand.hbm [shape: f32[1,8,256], index: 1, kind: input, shape index: {}]   ;;  %s278_s2 = inlined_call_operand.hbm [shape: f32[1,2], index: 2, kind: output, shape index: {}]  }
   0x1   :  { %8 = vsyncpa [#allocation8], 0 }
   0x2   :  { %9 = vsyncpa [#allocation6], 0  ;;  %s222_s9 = smov [#allocation4]   ;;  %s223_s11 = smov [#allocation7]  }
   0x3   :  { %s20_s10 = sshll.u32 %s222_s9, 4  ;;  %s34_s12 = sshll.u32 %s223_s11, 4  ;;  %s21_s10 = int_to_ptr.vmem [resolvable:$true] %s20_s10  ;;  %s35_s12 = int_to_ptr.vmem [resolvable:$true] %s34_s12 }
   0x4   :  { %s162_s15 = scalar_lea.hbm %s276_s0, 256 }
   0x5   :  { %p163_p0 = scmp.ne.s32.totalorder %s276_s0, %s162_s15  ;;  %p166_p1 = scmp.lt.u32.totalorder %s162_s15, %s276_s0 }
   0x7   :  { %p168_p2 = pnand %p166_p1, %p163_p0 }
   0x9   :  { %171 = shalt.err (!%p168_p2)
}
   0xa   :  { %s172_s20 = scalar_lea.vmem %s21_s10, 256  ;;  %p177_p4 = scmp.lt.s32.totalorder %s21_s10, %s21_s10 }
   0xb   :  { %p173_p3 = scmp.ne.s32.totalorder %s21_s10, %s172_s20  ;;  %p178_p5 = scmp.lt.s32.totalorder %s172_s20, %s172_s20 }
   0xd   :  { %p179_p6 = por %p178_p5, %p177_p4 }
   0xf   :  { %p180_p7 = pnand %p179_p6, %p173_p3 }
  0x11   :  { %183 = shalt.err (!%p180_p7)
}
  0x12   :  { %23 = dma.hbm_to_vmem [thread:$0]  %s276_s0, 256, %s21_s10, [#allocation5]  }
  0x13   :  { %s184_s25 = scalar_lea.hbm %s277_s1, 256 }
  0x14   :  { %p185_p8 = scmp.ne.s32.totalorder %s277_s1, %s184_s25  ;;  %p188_p9 = scmp.lt.u32.totalorder %s184_s25, %s277_s1 }
  0x16   :  { %p190_p10 = pnand %p188_p9, %p185_p8 }
  0x18   :  { %193 = shalt.err (!%p190_p10)
}
  0x19   :  { %s194_s30 = scalar_lea.vmem %s35_s12, 256  ;;  %p199_p12 = scmp.lt.s32.totalorder %s35_s12, %s35_s12 }
  0x1a   :  { %p195_p11 = scmp.ne.s32.totalorder %s35_s12, %s194_s30  ;;  %p200_p13 = scmp.lt.s32.totalorder %s194_s30, %s194_s30 }
  0x1c   :  { %p201_p0 = por %p200_p13, %p199_p12 }
  0x1e   :  { %p202_p1 = pnand %p201_p0, %p195_p11 }
  0x20   :  { %205 = shalt.err (!%p202_p1)
}
  0x21   :  { %37 = dma.hbm_to_vmem [thread:$0]  %s277_s1, 256, %s35_s12, [#allocation8]  }
  0x22   :  { %216 = dma.done.wait [#allocation5], 256  }
  0x23   :  { %217 = vsyncadd [#allocation5], 4294967040 }
  0x24   :  { %218 = dma.done.wait [#allocation8], 256  }
  0x25   :  { %219 = vsyncadd [#allocation8], 4294967040  ;;  %v57_v0 = vld [vmem:[#allocation4] sm:$0xff]  ;;  %v58_v1 = vld [vmem:[#allocation4 + $0x8] sm:$0xff]  ;;  %s206_s7 = scalar_lea.hbm %s278_s2, 16 }
  0x26   :  { %v63_v2 = vsub.f32 0.0, %v57_v0  ;;  %v64_v3 = vsub.f32 0.0, %v58_v1  ;;  %v61_v17 = vld [vmem:[#allocation7] sm:$0xff]  ;;  %v62_v19 = vld [vmem:[#allocation7 + $0x8] sm:$0xff]  ;;  %p207_p2 = scmp.ne.s32.totalorder %s278_s2, %s206_s7  ;;  %p210_p3 = scmp.lt.u32.totalorder %s206_s7, %s278_s2 }
  0x28   :  { %v65_v4 = vmul.f32 1.442695, %v63_v2  ;;  %v67_v5 = vmul.f32 1.442695, %v64_v3  ;;  %p212_p4 = pnand %p210_p3, %p207_p2 }
  0x2a   :  { %154 = vpow2.f32 %v65_v4 }
  0x2b   :  { %156 = vpow2.f32 %v67_v5 }
  0x34   :  { %v155_v6 = vpop.eup %154 }
  0x35   :  { %v157_v7 = vpop.eup %156  ;;  %v69_v8 = vadd.f32 1.0, %v155_v6 }
  0x36   :  { %v70_v9 = vadd.f32 1.0, %v157_v7 }
  0x37   :  { %v71_v10 = vmin.f32 %v69_v8, 1e+30 }
  0x38   :  { %v72_v11 = vmin.f32 %v70_v9, 1e+30 }
  0x39   :  { %158 = vrcp.f32 %v71_v10 }
  0x3a   :  { %160 = vrcp.f32 %v72_v11 }
  0x43   :  { %v159_v12 = vpop.eup %158 }
  0x44   :  { %v161_v13 = vpop.eup %160  ;;  %v75_v14 = vmul.f32 %v159_v12, %v71_v10 }
  0x45   :  { %v76_v15 = vmul.f32 %v161_v13, %v72_v11 }
  0x46   :  { %v77_v16 = vsub.f32 2.0, %v75_v14 }
  0x47   :  { %v78_v18 = vsub.f32 2.0, %v76_v15 }
  0x48   :  { %v79_v20 = vmul.f32 %v159_v12, %v77_v16 }
  0x49   :  { %v80_v21 = vmul.f32 %v161_v13, %v78_v18 }
  0x4a   :  { %v83_v22 = vmul.f32 %v79_v20, %v61_v17  ;;  %v93_v24 = vadd.f32 %v79_v20, %v61_v17 }
  0x4b   :  { %v84_v23 = vmul.f32 %v80_v21, %v62_v19  ;;  %v94_v25 = vadd.f32 %v80_v21, %v62_v19 }
  0x4d   :  { %v106_v26 = vadd.f32 %v84_v23, %v83_v22  ;;  %v120_v27 = vadd.f32 %v94_v25, %v93_v24 }
  0x4f   :  { %107 = vadd.xlane.f32.xlu0 %v106_v26 }
  0x53   :  { %121 = vadd.xlane.f32.xlu0 %v120_v27 }
  0xdc   :  { %v108_v28 = vpop.xlane.xlu0 %107 }
  0xdd   :  { %v109_v29 = vrot.slane %v108_v28, 4 }
  0xdf   :  { %v110_v30 = vadd.f32 %v109_v29, %v108_v28 }
  0xe0   :  { %v122_v31 = vpop.xlane.xlu0 %121 }
  0xe1   :  { %v111_v32 = vrot.slane %v110_v30, 2  ;;  %v123_v33 = vrot.slane %v122_v31, 4 }
  0xe3   :  { %v124_v34 = vadd.f32 %v123_v33, %v122_v31  ;;  %v112_v35 = vadd.f32 %v111_v32, %v110_v30 }
  0xe5   :  { %v125_v36 = vrot.slane %v124_v34, 2  ;;  %v113_v37 = vrot.slane %v112_v35, 1 }
  0xe7   :  { %v126_v38 = vadd.f32 %v125_v36, %v124_v34  ;;  %v114_v39 = vadd.f32 %v113_v37, %v112_v35 }
  0xe9   :  { %147 = vpush %v114_v39  ;;  %v127_v40 = vrot.slane %v126_v38, 1 }
  0xeb   :  { %v128_v41 = vadd.f32 %v127_v40, %v126_v38 }
  0xed   :  { %149 = vpush %v128_v41 }
 0x11a   :  { %s148_s1 = spop %147 }
 0x11b   :  { %117 = sst [smem:[#allocation9]] %s148_s1 }
 0x11e   :  { %s150_s4 = spop %149 }
 0x11f   :  { %131 = sst [smem:[#allocation9 + $0x1]] %s150_s4 }
 0x120   :  { %215 = shalt.err (!%p212_p4)
}
 0x121   :  { %s224_s12 = smov [#allocation9]  }
 0x122   :  { %139 = dma.smem_to_hbm %s224_s12, 16, %s278_s2, [#allocation6]  }
 0x123   :  { %220 = dma.done.wait [#allocation6], 16  }
 0x124   :  { %221 = vsyncadd [#allocation6], 4294967280 }
 0x125   :  { %143 = sfence }
 0x126   :  { %144 = vsyncpa [#allocation5], 1 }
 0x127   :  { %145 = vsyncpa [#allocation8], 1 }
 0x128   :  { %146 = vsyncpa [#allocation6], 1 }

</bundles_post_ra>
